<compile_context>
chip_gen: v6e
topology: v6e:2x2x1
jax: 0.10.0
libtpu: 0.0.40
codegen_flags: <defaults>
</compile_context>

<pallas_src>
import jax
import jax.numpy as jnp
import numpy as np
from jax.experimental import pallas as pl
from jax.experimental.pallas import tpu as pltpu

LANE = 128
SUBLANE = 8


def _round_up(n, m):
    return ((n + m - 1) // m) * m


def _linear_kernel_packed(x_ref, w_ref, b_ref, o_ref):
    # x_ref: (tm, 128) VMEM tile -- `pack` samples per row, lane-dense.
    # w_ref: (128, pack) block-diagonal weights, resident (constant index_map).
    # b_ref: (1,)  SMEM scalar bias.
    # o_ref: (tm, pack) output tile (pack dot products per packed row).
    o_ref[...] = (
        jnp.dot(
            x_ref[...],
            w_ref[...],
            preferred_element_type=jnp.float32,
            precision=jax.lax.Precision.HIGHEST,
        )
        + b_ref[0]
    )


def _linear_kernel_generic(x_ref, w_ref, b_ref, o_ref):
    # Fallback when F does not pack into 128 lanes: VPU multiply (weight row
    # sublane-broadcast against the x tile) + XLU lane reduction.
    prod = x_ref[...] * w_ref[...]                       # (tm, F)
    o_ref[...] = jnp.sum(prod, axis=-1, keepdims=True) + b_ref[0]


def optimize_aug_forward(x, w, b, *,
                         vmem_budget_bytes=24 * 1024 * 1024,
                         max_tile_samples=None):
    """Pallas forward for Optimize_aug: pred = x @ w + b.

    x : (M, F) float32
    w : (F, 1) or (F,) float32
    b : scalar / (1,) / (1, 1) float32
    returns (M, 1) float32
    """
    M, F = x.shape
    x = jnp.asarray(x, jnp.float32)
    w_col = jnp.asarray(w, jnp.float32).reshape(F)
    b_s = jnp.asarray(b, jnp.float32).reshape(1)

    pack = LANE // F if (0 < F <= LANE and LANE % F == 0) else 1

    if pack > 1:
        # ------------------ lane-dense packed path --------------------------
        m_unit = pack * SUBLANE                       # keep packed rows % 8 == 0
        M_pad = _round_up(max(M, 1), m_unit)
        if M_pad != M:
            x = jnp.pad(x, ((0, M_pad - M), (0, 0)))  # zero rows, sliced off below
        Mp = M_pad // pack
        xp = x.reshape(Mp, pack * F)                  # free row-major reshape

        # Block-diagonal weight: W_blk[j*F + l, k] = w[l] if j == k else 0.
        eye = jnp.eye(pack, dtype=jnp.float32)
        w_blk = (eye[:, None, :] * w_col[None, :, None]).reshape(pack * F, pack)

        # Padded per-step VMEM: (tm,128) x block + (tm,pack) output block
        # (lane-padded to (tm,128) in VMEM), each double-buffered:
        #   ~ tm * 128 * 4 B * 4 = tm * 2 KiB.
        step_row_bytes = 4 * LANE * 2 * 2
        tm = max(SUBLANE,
                 (vmem_budget_bytes // step_row_bytes) // SUBLANE * SUBLANE)
        if max_tile_samples is not None:
            cap = max(SUBLANE, (max_tile_samples // pack) // SUBLANE * SUBLANE)
            tm = min(tm, cap)
        if Mp <= tm:
            # Fits one step under budget.  If bandwidth-bound, keep >= 2 grid
            # steps so the "parallel" axis shards across both v7x TensorCores.
            if Mp * LANE * 4 >= (2 << 20):
                tm = max(SUBLANE, _round_up(pl.cdiv(Mp, 2), SUBLANE))
            else:
                tm = Mp
        tm = min(tm, Mp)

        grid = (pl.cdiv(Mp, tm),)
        step_vmem = tm * step_row_bytes + 2 * (LANE * pack * 4)
        cost = pl.CostEstimate(
            flops=2 * M * F,
            transcendentals=0,
            bytes_accessed=4 * (M * F + F * pack + 1 + M),
        )

        out = pl.pallas_call(
            _linear_kernel_packed,
            out_shape=jax.ShapeDtypeStruct((Mp, pack), jnp.float32),
            grid_spec=pltpu.PrefetchScalarGridSpec(
                num_scalar_prefetch=0,
                grid=grid,
                in_specs=[
                    pl.BlockSpec((tm, LANE), lambda i: (i, 0)),    # packed x tile
                    pl.BlockSpec((LANE, pack), lambda i: (0, 0)),  # resident weights
                    pl.BlockSpec(memory_space=pltpu.MemorySpace.SMEM),  # bias
                ],
                out_specs=pl.BlockSpec((tm, pack), lambda i: (i, 0)),
            ),
            compiler_params=pltpu.CompilerParams(
                dimension_semantics=("parallel",),
                vmem_limit_bytes=int(
                    min(64 * 2**20, max(step_vmem + (2 << 20), 4 << 20))),
            ),
            cost_estimate=cost,
        )(xp, w_blk, b_s)
        # (Mp, pack) -> (M_pad, 1) is the inverse free reshape; drop pad rows.
        return out.reshape(M_pad, 1)[:M]

    # ------------------ generic path (F does not divide 128) ----------------
    w_row = w_col.reshape(1, F)
    Fp = _round_up(F, LANE)                           # lane-padded width in VMEM
    step_row_bytes = 4 * (Fp + LANE) * 2              # x + lane-padded out, x2 bufs
    tm = max(SUBLANE, (vmem_budget_bytes // step_row_bytes) // SUBLANE * SUBLANE)
    if max_tile_samples is not None:
        tm = min(tm, max(SUBLANE, (max_tile_samples // SUBLANE) * SUBLANE))
    if M <= tm:
        if M * Fp * 4 >= (2 << 20):
            tm = max(SUBLANE, _round_up(pl.cdiv(M, 2), SUBLANE))
        else:
            tm = M
    tm = min(tm, M)
    if tm != M:
        tm = max(SUBLANE, (tm // SUBLANE) * SUBLANE)

    grid = (pl.cdiv(M, tm),)
    step_vmem = tm * step_row_bytes + 2 * (Fp * 4)
    cost = pl.CostEstimate(
        flops=2 * M * F,
        transcendentals=0,
        bytes_accessed=4 * (M * F + F + 1 + M),
    )

    return pl.pallas_call(
        _linear_kernel_generic,
        out_shape=jax.ShapeDtypeStruct((M, 1), jnp.float32),
        grid_spec=pltpu.PrefetchScalarGridSpec(
            num_scalar_prefetch=0,
            grid=grid,
            in_specs=[
                pl.BlockSpec((tm, F), lambda i: (i, 0)),
                pl.BlockSpec((1, F), lambda i: (0, 0)),
                pl.BlockSpec(memory_space=pltpu.MemorySpace.SMEM),
            ],
            out_specs=pl.BlockSpec((tm, 1), lambda i: (i, 0)),
        ),
        compiler_params=pltpu.CompilerParams(
            dimension_semantics=("parallel",),
            vmem_limit_bytes=int(
                min(64 * 2**20, max(step_vmem + (2 << 20), 4 << 20))),
        ),
        cost_estimate=cost,
    )(x, w_row, b_s)


def data_aug(ds_train, ds_shared, pred_shared, A, regularizer_term):
    """Numpy glue port of Data_augmentation.data_aug (host-side, no hot-path compute)."""
    X, y = ds_train[0], ds_train[1].reshape(-1)
    nn_nodes = pred_shared.shape[0]
    X_shared_repeat = np.tile(ds_shared, (nn_nodes, 1))
    X_aug = np.concatenate((X, X_shared_repeat), axis=0)
    y_aug = np.concatenate((y, pred_shared.reshape(-1)), axis=0)
    m = y.shape[0]
    m_shared = ds_shared.shape[0]
    A_repeat = np.repeat(A, m_shared, axis=0)
    sample_weight = np.concatenate(
        (np.ones((m,)),
         np.ones((nn_nodes * m_shared,)) * (regularizer_term / 2.0) * A_repeat)
    )
    return X_aug, y_aug.reshape(-1, 1), sample_weight


if __name__ == "__main__":
    key = jax.random.PRNGKey(0)
    kx, ky, kxs, kp, kw, kb, kx2, kx3, kw3 = jax.random.split(key, 9)

    n_features = 32
    m_local = 96         # local train samples
    m_shared = 8         # shared dataset size
    n_nodes = 4          # number of nodes

    # Build the augmented input via the glue data_aug, exactly like `update` would.
    X_local = np.asarray(jax.random.normal(kx, (m_local, n_features), jnp.float32))
    y_local = np.asarray(jax.random.normal(ky, (m_local,), jnp.float32))
    X_shared = np.asarray(jax.random.normal(kxs, (m_shared, n_features), jnp.float32))
    preds_shared = np.asarray(jax.random.normal(kp, (n_nodes, m_shared), jnp.float32))
    A = np.ones((n_nodes,), dtype=np.float32)
    X_aug, y_aug, sw = data_aug((X_local, y_local), X_shared, preds_shared, A, 0.5)

    x = jnp.asarray(X_aug, dtype=jnp.float32)            # (128, 32)
    assert x.shape == (m_local + n_nodes * m_shared, n_features)

    # Deterministic model parameters (Linear(n_features, 1)).
    w = jax.random.normal(kw, (n_features, 1), jnp.float32) * 0.1
    b = jax.random.normal(kb, (1, 1), jnp.float32) * 0.1

    def np_ref(xa, wa, ba):
        return (np.asarray(xa, np.float32) @ np.asarray(wa, np.float32).reshape(-1, 1)
                + np.float32(np.asarray(ba).reshape(-1)[0]))

    # --- primary check: packed single-step path (the shipped shapes) --------
    pred = jax.block_until_ready(optimize_aug_forward(x, w, b))
    assert pred.shape == (x.shape[0], 1)
    np.testing.assert_allclose(np.asarray(pred), np_ref(x, w, b), rtol=1e-5, atol=1e-5)

    # --- multi-tile packed path with ragged M (padding + masked writeback) --
    x2 = jax.random.normal(kx2, (200, n_features), jnp.float32)
    pred2 = jax.block_until_ready(
        optimize_aug_forward(x2, w, b, max_tile_samples=64))
    np.testing.assert_allclose(np.asarray(pred2), np_ref(x2, w, b), rtol=1e-5, atol=1e-5)

    # --- generic fallback path (F does not divide 128) -----------------------
    f3 = 48
    x3 = jax.random.normal(kx3, (64, f3), jnp.float32)
    w3 = jax.random.normal(kw3, (f3, 1), jnp.float32) * 0.1
    pred3 = jax.block_until_ready(optimize_aug_forward(x3, w3, b))
    np.testing.assert_allclose(np.asarray(pred3), np_ref(x3, w3, b), rtol=1e-5, atol=1e-5)

    print("KERNEL_OK")
</pallas_src>

<mosaic_0001>
module attributes {stable_mosaic.version = 11 : i64} {
  func.func @_linear_kernel_packed(%arg0: i32, %arg1: memref<32x128xf32, #tpu.memory_space<vmem>>, %arg2: memref<128x4xf32, #tpu.memory_space<vmem>>, %arg3: memref<1xf32, #tpu.memory_space<smem>>, %arg4: memref<32x4xf32, #tpu.memory_space<vmem>>) attributes {dimension_semantics = [#tpu.dimension_semantics<parallel>], iteration_bounds = array<i64: 1>, scalar_prefetch = 0 : i64, scratch_operands = 0 : i64, tpu.core_type = #tpu.core_type<tc>, window_params = [{transform_indices = @transform_0, window_bounds = array<i64: 32, 128>}, {pipeline_mode = #tpu.pipeline_mode<synchronous>, transform_indices = @transform_1, window_bounds = array<i64: 128, 4>}, {transform_indices = @transform_2, window_bounds = array<i64: 1>}, {transform_indices = @transform_3, window_bounds = array<i64: 32, 4>}]} {
    %c0 = arith.constant 0 : index
    %c0_0 = arith.constant 0 : index
    %0 = vector.load %arg1[%c0, %c0_0] : memref<32x128xf32, #tpu.memory_space<vmem>>, vector<32x128xf32>
    %c0_1 = arith.constant 0 : index
    %c0_2 = arith.constant 0 : index
    %1 = vector.load %arg2[%c0_1, %c0_2] : memref<128x4xf32, #tpu.memory_space<vmem>>, vector<128x4xf32>
    %cst = arith.constant dense<0.000000e+00> : vector<32x4xf32>
    %2 = tpu.matmul %0, %1, %cst {dimension_numbers = #tpu.dot_dimension_numbers<[1], [0], [0], [1], [0, 0, 1, 1], [], []>, precision = #tpu.contract_precision<fp32>} : vector<32x128xf32>, vector<128x4xf32>, vector<32x4xf32> -> vector<32x4xf32>
    %c0_3 = arith.constant 0 : index
    %3 = memref.load %arg3[%c0_3] : memref<1xf32, #tpu.memory_space<smem>>
    %4 = vector.broadcast %3 : f32 to vector<32x4xf32>
    %5 = arith.addf %2, %4 : vector<32x4xf32>
    %c0_4 = arith.constant 0 : index
    %c0_5 = arith.constant 0 : index
    %6 = vector.load %arg4[%c0_4, %c0_5] : memref<32x4xf32, #tpu.memory_space<vmem>>, vector<32x4xf32>
    tpu.vector_store %arg4[%c0_4, %c0_5], %5 {strides = array<i32>} : memref<32x4xf32, #tpu.memory_space<vmem>>, vector<32x4xf32>,
    return
  }
  func.func @transform_0(%arg0: i32) -> (i32, i32) {
    %c0_i32 = arith.constant 0 : i32
    %c0_i32_0 = arith.constant 0 : i32
    return %arg0, %c0_i32 : i32, i32
  }
  func.func @transform_1(%arg0: i32) -> (i32, i32) {
    %c0_i32 = arith.constant 0 : i32
    %c0_i32_0 = arith.constant 0 : i32
    %c0_i32_1 = arith.constant 0 : i32
    return %c0_i32, %c0_i32_0 : i32, i32
  }
  func.func @transform_2(%arg0: i32) -> i32 {
    %c0_i32 = arith.constant 0 : i32
    %c0_i32_0 = arith.constant 0 : i32
    return %c0_i32 : i32
  }
  func.func @transform_3(%arg0: i32) -> (i32, i32) {
    %c0_i32 = arith.constant 0 : i32
    %c0_i32_0 = arith.constant 0 : i32
    return %arg0, %c0_i32 : i32, i32
  }
}

</mosaic_0001>

<bundles_post_ra>
// kernel: tpu_custom_call.1
= control target key start
LH: loop header
LB: loop body
LE: loop exit
PB: predicated region body
PF: predicated region fallthrough
CT: control target
= control target key end

     0   :  { %vm807_vm0 = vcmask 31744   ;;  %s1643_s1 = inlined_call_operand.vmem [shape: f32[128,4], index: 1, kind: input, shape index: {}]   ;;  %s1644_s0 = inlined_call_operand.vmem [shape: f32[32,128], index: 0, kind: input, shape index: {}]   ;;  %s1645_s2 = inlined_call_operand.<no memory space> [shape: f32[1], index: 2, kind: input, shape index: {}]   ;;  %s1646_s3 = inlined_call_operand.vmem [shape: f32[32,4], index: 3, kind: output, shape index: {}]  }
   0x1   :  { %v34_v0 = vld [vmem:[%s1643_s1 + $0x78] sm:$0xff]  ;;  %v33_v1 = vld [vmem:[%s1643_s1 + $0x70] sm:$0xff]  ;;  %v32_v2 = vld [vmem:[%s1643_s1 + $0x68] sm:$0xff] }
   0x2   :  { %v1193_v3 = vand.u32 4294901760, %v34_v0  ;;  %v1195_v4 = vand.u32 4294901760, %v33_v1  ;;  %v1197_v5 = vand.u32 4294901760, %v32_v2  ;;  %v31_v6 = vld [vmem:[%s1643_s1 + $0x60] sm:$0xff]  ;;  %v30_v7 = vld [vmem:[%s1643_s1 + $0x58] sm:$0xff]  ;;  %v29_v8 = vld [vmem:[%s1643_s1 + $0x50] sm:$0xff] }
   0x3   :  { %v1208_v9 = vand.u32 4294901760, %v31_v6  ;;  %v1210_v10 = vand.u32 4294901760, %v30_v7  ;;  %v1212_v11 = vand.u32 4294901760, %v29_v8  ;;  %v28_v12 = vld [vmem:[%s1643_s1 + $0x48] sm:$0xff]  ;;  %v27_v13 = vld [vmem:[%s1643_s1 + $0x40] sm:$0xff]  ;;  %v26_v18 = vld [vmem:[%s1643_s1 + $0x38] sm:$0xff] }
   0x4   :  { %936 = vmatprep.subr.mxu0 %v1193_v3  ;;  %v1222_v14 = vsub.f32 %v34_v0, %v1193_v3  ;;  %v1225_v15 = vsub.f32 %v33_v1, %v1195_v4  ;;  %v1227_v16 = vand.u32 4294901760, %v28_v12  ;;  %v1230_v17 = vsub.f32 %v32_v2, %v1197_v5  ;;  %v25_v25 = vld [vmem:[%s1643_s1 + $0x30] sm:$0xff]  ;;  %v24_v35 = vld [vmem:[%s1643_s1 + $0x28] sm:$0xff]  ;;  %v23_v40 = vld [vmem:[%s1643_s1 + $0x20] sm:$0xff] }
   0x5   :  { %937 = vmatpush3.msra.mxu0 %v1193_v3  ;;  %v1237_v19 = vsub.f32 %v31_v6, %v1208_v9  ;;  %v1240_v20 = vsub.f32 %v30_v7, %v1210_v10  ;;  %v1252_v24 = vand.u32 4294901760, %v27_v13  ;;  %v1261_v27 = vand.u32 4294901760, %v26_v18  ;;  %v22_v48 = vld [vmem:[%s1643_s1 + $0x18] sm:$0xff]  ;;  %v15_v49 = vld [vmem:[%s1644_s0] sm:$0xff]  ;;  %v16_v54 = vld [vmem:[%s1644_s0 + $0x8] sm:$0xff] }
   0x6   :  { %938 = vmatprep.subr.mxu0 %v1195_v4  ;;  %v1244_v21 = vand.u32 4294901760, %v1222_v14  ;;  %v1247_v22 = vand.u32 4294901760, %v1225_v15  ;;  %v1250_v23 = vand.u32 4294901760, %v1230_v17  ;;  %v1267_v29 = vsub.f32 %v29_v8, %v1212_v11  ;;  %v21_v59 = vld [vmem:[%s1643_s1 + $0x10] sm:$0xff]  ;;  %v20_v2 = vld [vmem:[%s1643_s1 + $0x8] sm:$0xff] }
   0x7   :  { %939 = vmatpush3.msra.mxu0 %v1195_v4  ;;  %v1259_v26 = vand.u32 4294901760, %v1237_v19  ;;  %v1264_v28 = vand.u32 4294901760, %v1240_v20  ;;  %v1277_v33 = vsub.f32 %v28_v12, %v1227_v16  ;;  %v1280_v34 = vand.u32 4294901760, %v25_v25 }
   0x8   :  { %940 = vmatprep.subr.mxu0 %v1197_v5  ;;  %v162_v30 = vsub.f32 %v1222_v14, %v1244_v21  ;;  %v169_v31 = vsub.f32 %v1225_v15, %v1247_v22  ;;  %v176_v32 = vsub.f32 %v1230_v17, %v1250_v23  ;;  %v1289_v39 = vand.u32 4294901760, %v1267_v29 }
   0x9   :  { %941 = vmatpush3.msra.mxu0 %v1197_v5  ;;  %v183_v38 = vsub.f32 %v1237_v19, %v1259_v26  ;;  %v190_v41 = vsub.f32 %v1240_v20, %v1264_v28  ;;  %v1298_v42 = vand.u32 4294901760, %v1277_v33  ;;  %v1301_v43 = vsub.f32 %v27_v13, %v1252_v24 }
   0xa   :  { %942 = vmatprep.subr.mxu0 %v1208_v9  ;;  %v163_v36 = vand.u32 4294901760, %v162_v30  ;;  %v170_v37 = vand.u32 4294901760, %v169_v31  ;;  %v177_v44 = vand.u32 4294901760, %v176_v32  ;;  %v1304_v45 = vand.u32 4294901760, %v24_v35 }
   0xb   :  { %943 = vmatpush3.msra.mxu0 %v1208_v9  ;;  %v1307_v46 = vsub.f32 %v26_v18, %v1261_v27  ;;  %v1310_v47 = vand.u32 4294901760, %v23_v40  ;;  %v184_v50 = vand.u32 4294901760, %v183_v38  ;;  %v197_v51 = vsub.f32 %v1267_v29, %v1289_v39  ;;  %v19_v18 = vld [vmem:[%s1643_s1] sm:$0xff] }
   0xc   :  { %944 = vmatprep.subr.mxu0 %v1210_v10  ;;  %974 = vmatprep.subr.mxu1 %v163_v36  ;;  %v1322_v52 = vand.u32 4294901760, %v1301_v43  ;;  %v1325_v53 = vsub.f32 %v25_v25, %v1280_v34  ;;  %v191_v55 = vand.u32 4294901760, %v190_v41  ;;  %v204_v56 = vsub.f32 %v1277_v33, %v1298_v42 }
   0xd   :  { %945 = vmatpush3.msra.mxu0 %v1210_v10  ;;  %975 = vmatpush3.msra.mxu1 %v163_v36  ;;  %v1334_v57 = vand.u32 4294901760, %v22_v48  ;;  %v1337_v58 = vand.u32 4294901760, %v1307_v46  ;;  %v1343_v60 = vsub.f32 %v24_v35, %v1304_v45  ;;  %v1345_v61 = vand.u32 4294901760, %v15_v49 }
   0xe   :  { %946 = vmatprep.subr.mxu0 %v1212_v11  ;;  %976 = vmatprep.subr.mxu1 %v170_v37  ;;  %v1348_v62 = vand.u32 4294901760, %v16_v54  ;;  %v198_v63 = vand.u32 4294901760, %v197_v51  ;;  %v211_v0 = vsub.f32 %v1301_v43, %v1322_v52  ;;  %v1354_v1 = vand.u32 4294901760, %v1325_v53 }
   0xf   :  { %947 = vmatpush3.msra.mxu0 %v1212_v11  ;;  %977 = vmatpush3.msra.mxu1 %v170_v37  ;;  %v1360_v6 = vsub.f32 %v23_v40, %v1310_v47  ;;  %v205_v7 = vand.u32 4294901760, %v204_v56  ;;  %v1363_v8 = vand.u32 4294901760, %v21_v59  ;;  %v218_v12 = vsub.f32 %v1307_v46, %v1337_v58 }
  0x10   :  { %948 = vmatprep.subr.mxu0 %v1227_v16  ;;  %978 = vmatprep.subr.mxu1 %v177_v44  ;;  %v1369_v13 = vand.u32 4294901760, %v1343_v60  ;;  %v1375_v25 = vsub.f32 %v15_v49, %v1345_v61  ;;  %v1378_v30 = vsub.f32 %v22_v48, %v1334_v57  ;;  %v1381_v31 = vand.u32 4294901760, %v20_v2 }
  0x11   :  { %949 = vmatpush3.msra.mxu0 %v1227_v16  ;;  %979 = vmatpush3.msra.mxu1 %v177_v44  ;;  %v1384_v32 = vsub.f32 %v16_v54, %v1348_v62  ;;  %v212_v35 = vand.u32 4294901760, %v211_v0  ;;  %v225_v36 = vsub.f32 %v1325_v53, %v1354_v1  ;;  %v1390_v37 = vand.u32 4294901760, %v1360_v6 }
  0x12   :  { %950 = vmatprep.subr.mxu0 %v1252_v24  ;;  %980 = vmatprep.subr.mxu1 %v184_v50  ;;  %v1393_v38 = vand.u32 4294901760, %v19_v18  ;;  %v1396_v40 = vsub.f32 %v21_v59, %v1363_v8  ;;  %v219_v41 = vand.u32 4294901760, %v218_v12  ;;  %v232_v44 = vsub.f32 %v1343_v60, %v1369_v13 }
  0x13   :  { %951 = vmatpush3.msra.mxu0 %v1252_v24  ;;  %981 = vmatpush3.msra.mxu1 %v184_v50  ;;  %v1648_v48 = vand.u32 4294901760, %v1375_v25  ;;  %v1403_v49 = vand.u32 4294901760, %v1378_v30  ;;  %v1647_v50 = vand.u32 4294901760, %v1384_v32  ;;  %v1408_v51 = vsub.f32 %v20_v2, %v1381_v31 }
  0x14   :  { %952 = vmatprep.subr.mxu0 %v1261_v27  ;;  %982 = vmatprep.subr.mxu1 %v191_v55  ;;  %v226_v54 = vand.u32 4294901760, %v225_v36  ;;  %v1415_v56 = vand.u32 4294901760, %v1396_v40  ;;  %v1418_v59 = vsub.f32 %v19_v18, %v1393_v38 }
  0x15   :  { %953 = vmatpush3.msra.mxu0 %v1261_v27  ;;  %983 = vmatpush3.msra.mxu1 %v191_v55  ;;  %v239_v55 = vsub.f32 %v1360_v6, %v1390_v37  ;;  %v121_v0 = vsub.f32 %v1375_v25, %v1648_v48  ;;  %v246_v2 = vsub.f32 %v1378_v30, %v1403_v49  ;;  %v1431_v12 = vand.u32 4294901760, %v1408_v51 }
  0x16   :  { %954 = vmatprep.subr.mxu0 %v1280_v34  ;;  %984 = vmatprep.subr.mxu1 %v198_v63  ;;  %v1438_v36 = vand.u32 4294901760, %v1418_v59 }
  0x17   :  { %955 = vmatpush3.msra.mxu0 %v1280_v34  ;;  %985 = vmatpush3.msra.mxu1 %v198_v63  ;;  %v233_v63 = vand.u32 4294901760, %v232_v44  ;;  %v240_v18 = vand.u32 4294901760, %v239_v55  ;;  %v247_v44 = vand.u32 4294901760, %v246_v2  ;;  %v260_v55 = vsub.f32 %v1408_v51, %v1431_v12 }
  0x18   :  { %956 = vmatprep.subr.mxu0 %v1304_v45  ;;  %986 = vmatprep.subr.mxu1 %v205_v7  ;;  %v267_v48 = vsub.f32 %v1418_v59, %v1438_v36 }
  0x19   :  { %957 = vmatpush3.msra.mxu0 %v1304_v45  ;;  %987 = vmatpush3.msra.mxu1 %v205_v7  ;;  %v131_v7 = vsub.f32 %v1384_v32, %v1647_v50 }
  0x1a   :  { %958 = vmatprep.subr.mxu0 %v1310_v47  ;;  %988 = vmatprep.subr.mxu1 %v212_v35 }
  0x1b   :  { %959 = vmatpush3.msra.mxu0 %v1310_v47  ;;  %989 = vmatpush3.msra.mxu1 %v212_v35  ;;  %v253_v35 = vsub.f32 %v1396_v40, %v1415_v56  ;;  %v132_v50 = vand.u32 4294901760, %v131_v7 }
  0x1c   :  { %960 = vmatprep.subr.mxu0 %v1334_v57  ;;  %990 = vmatprep.subr.mxu1 %v219_v41 }
  0x1d   :  { %961 = vmatpush3.msra.mxu0 %v1334_v57  ;;  %991 = vmatpush3.msra.mxu1 %v219_v41  ;;  %v122_v41 = vand.u32 4294901760, %v121_v0  ;;  %v268_v0 = vand.u32 4294901760, %v267_v48 }
  0x1e   :  { %962 = vmatprep.subr.mxu0 %v1363_v8  ;;  %992 = vmatprep.subr.mxu1 %v226_v54 }
  0x1f   :  { %963 = vmatpush3.msra.mxu0 %v1363_v8  ;;  %993 = vmatpush3.msra.mxu1 %v226_v54  ;;  %v254_v54 = vand.u32 4294901760, %v253_v35 }
  0x20   :  { %964 = vmatprep.subr.mxu0 %v1381_v31  ;;  %994 = vmatprep.subr.mxu1 %v233_v63 }
  0x21   :  { %965 = vmatpush3.msra.mxu0 %v1381_v31  ;;  %995 = vmatpush3.msra.mxu1 %v233_v63  ;;  %v261_v63 = vand.u32 4294901760, %v260_v55 }
  0x22   :  { %966 = vmatprep.subr.mxu0 %v1393_v38  ;;  %996 = vmatprep.subr.mxu1 %v240_v18 }
  0x23   :  { %967 = vmatpush3.msra.mxu0 %v1393_v38  ;;  %997 = vmatpush3.msra.mxu1 %v240_v18 }
  0x24   :  { %968 = vmatprep.mubr.f32.mxu0 %v122_v41  ;;  %998 = vmatprep.subr.mxu1 %v247_v44 }
  0x25   :  { %1012 = vmatprep.subr.mxu0 %v1222_v14  ;;  %969 = vmatmul.mubr.f32.vlgmr.msra.gmra.mxu0 %v132_v50  ;;  %v17_v50 = vld [vmem:[%s1644_s0 + $0x10] sm:$0xff] }
  0x26   :  { %999 = vmatpush3.msra.mxu1 %v247_v44  ;;  %1013 = vmatpush3.msra.mxu0 %v1222_v14  ;;  %v18_v14 = vld [vmem:[%s1644_s0 + $0x18] sm:$0xff] }
  0x27   :  { %1000 = vmatprep.subr.mxu1 %v254_v54  ;;  %1014 = vmatprep.subr.mxu0 %v1225_v15 }
  0x28   :  { %1001 = vmatpush3.msra.mxu1 %v254_v54  ;;  %1015 = vmatpush3.msra.mxu0 %v1225_v15  ;;  %v1464_v15 = vand.u32 4294901760, %v17_v50 }
  0x29   :  { %1002 = vmatprep.subr.mxu1 %v261_v63  ;;  %1016 = vmatprep.subr.mxu0 %v1230_v17 }
  0x2a   :  { %1003 = vmatpush3.msra.mxu1 %v261_v63  ;;  %1017 = vmatpush3.msra.mxu0 %v1230_v17  ;;  %v1468_v17 = vand.u32 4294901760, %v18_v14 }
  0x2b   :  { %1004 = vmatprep.subr.mxu1 %v268_v0  ;;  %1018 = vmatprep.subr.mxu0 %v1237_v19 }
  0x2c   :  { %1005 = vmatpush3.msra.mxu1 %v268_v0  ;;  %1006 = vmatprep.mubr.f32.mxu1 %v1345_v61  ;;  %v1482_v48 = vsub.f32 %v18_v14, %v1468_v17 }
  0x2d   :  { %1019 = vmatpush3.msra.mxu0 %v1237_v19  ;;  %1007 = vmatmul.mubr.f32.vlgmr.msra.gmra.mxu1 %v1348_v62  ;;  %v1477_v19 = vsub.f32 %v17_v50, %v1464_v15 }
  0x2e   :  { %1020 = vmatprep.subr.mxu0 %v1240_v20  ;;  %1050 = vmatprep.subr.mxu1 %v1193_v3 }
  0x2f   :  { %1021 = vmatpush3.msra.mxu0 %v1240_v20  ;;  %1051 = vmatpush3.msra.mxu1 %v1193_v3  ;;  %v140_v20 = vand.u32 4294901760, %v1477_v19 }
  0x30   :  { %1022 = vmatprep.subr.mxu0 %v1267_v29  ;;  %1052 = vmatprep.subr.mxu1 %v1195_v4 }
  0x31   :  { %1023 = vmatpush3.msra.mxu0 %v1267_v29  ;;  %1053 = vmatpush3.msra.mxu1 %v1195_v4  ;;  %v150_v29 = vand.u32 4294901760, %v1482_v48 }
  0x32   :  { %1024 = vmatprep.subr.mxu0 %v1277_v33  ;;  %1054 = vmatprep.subr.mxu1 %v1197_v5 }
  0x33   :  { %1025 = vmatpush3.msra.mxu0 %v1277_v33  ;;  %1055 = vmatpush3.msra.mxu1 %v1197_v5  ;;  %v141_v33 = vsub.f32 %v1477_v19, %v140_v20 }
  0x34   :  { %1026 = vmatprep.subr.mxu0 %v1301_v43  ;;  %1056 = vmatprep.subr.mxu1 %v1208_v9 }
  0x35   :  { %1027 = vmatpush3.msra.mxu0 %v1301_v43  ;;  %1057 = vmatpush3.msra.mxu1 %v1208_v9  ;;  %v151_v43 = vsub.f32 %v1482_v48, %v150_v29 }
  0x36   :  { %1028 = vmatprep.subr.mxu0 %v1307_v46  ;;  %1058 = vmatprep.subr.mxu1 %v1210_v10 }
  0x37   :  { %1029 = vmatpush3.msra.mxu0 %v1307_v46  ;;  %1059 = vmatpush3.msra.mxu1 %v1210_v10  ;;  %v142_v46 = vand.u32 4294901760, %v141_v33 }
  0x38   :  { %1030 = vmatprep.subr.mxu0 %v1325_v53  ;;  %1060 = vmatprep.subr.mxu1 %v1212_v11 }
  0x39   :  { %1031 = vmatpush3.msra.mxu0 %v1325_v53  ;;  %1061 = vmatpush3.msra.mxu1 %v1212_v11  ;;  %v152_v53 = vand.u32 4294901760, %v151_v43 }
  0x3a   :  { %1032 = vmatprep.subr.mxu0 %v1343_v60  ;;  %1062 = vmatprep.subr.mxu1 %v1227_v16 }
  0x3b   :  { %1033 = vmatpush3.msra.mxu0 %v1343_v60  ;;  %1063 = vmatpush3.msra.mxu1 %v1227_v16 }
  0x3c   :  { %1034 = vmatprep.subr.mxu0 %v1360_v6  ;;  %1064 = vmatprep.subr.mxu1 %v1252_v24 }
  0x3d   :  { %1035 = vmatpush3.msra.mxu0 %v1360_v6  ;;  %1065 = vmatpush3.msra.mxu1 %v1252_v24 }
  0x3e   :  { %1036 = vmatprep.subr.mxu0 %v1378_v30  ;;  %1066 = vmatprep.subr.mxu1 %v1261_v27 }
  0x3f   :  { %1037 = vmatpush3.msra.mxu0 %v1378_v30  ;;  %1067 = vmatpush3.msra.mxu1 %v1261_v27 }
  0x40   :  { %1038 = vmatprep.subr.mxu0 %v1396_v40  ;;  %1068 = vmatprep.subr.mxu1 %v1280_v34 }
  0x41   :  { %971 = vmatprep.mubr.f32.mxu0 %v142_v46  ;;  %1039 = vmatpush3.msra.mxu0 %v1396_v40 }
  0x42   :  { %1069 = vmatpush3.msra.mxu1 %v1280_v34  ;;  %972 = vmatmul.mubr.f32.gmra.mxu0 %v152_v53 }
  0x43   :  { %1040 = vmatprep.subr.mxu0 %v1408_v51  ;;  %1070 = vmatprep.subr.mxu1 %v1304_v45 }
  0x44   :  { %1041 = vmatpush3.msra.mxu0 %v1408_v51  ;;  %1071 = vmatpush3.msra.mxu1 %v1304_v45 }
  0x45   :  { %1042 = vmatprep.subr.mxu0 %v1418_v59  ;;  %1072 = vmatprep.subr.mxu1 %v1310_v47 }
  0x46   :  { %1043 = vmatpush3.msra.mxu0 %v1418_v59  ;;  %1044 = vmatprep.mubr.f32.mxu0 %v1375_v25 }
  0x47   :  { %1073 = vmatpush3.msra.mxu1 %v1310_v47  ;;  %1045 = vmatmul.mubr.f32.vlgmr.msra.gmra.mxu0 %v1384_v32 }
  0x48   :  { %1074 = vmatprep.subr.mxu1 %v1334_v57  ;;  %1088 = vmatprep.subr.mxu0 %v1244_v21 }
  0x49   :  { %1075 = vmatpush3.msra.mxu1 %v1334_v57  ;;  %1089 = vmatpush3.msra.mxu0 %v1244_v21  ;;  %v1649_v21 = vand.u32 4294901760, %v1375_v25 }
  0x4a   :  { %1009 = vmatprep.mubr.f32.mxu1 %v1464_v15  ;;  %1076 = vmatprep.subr.mxu1 %v1363_v8 }
  0x4b   :  { %1090 = vmatprep.subr.mxu0 %v1247_v22  ;;  %1010 = vmatmul.mubr.f32.gmra.mxu1 %v1468_v17 }
  0x4c   :  { %1077 = vmatpush3.msra.mxu1 %v1363_v8  ;;  %1091 = vmatpush3.msra.mxu0 %v1247_v22  ;;  %v1650_v22 = vand.u32 4294901760, %v1384_v32 }
  0x4d   :  { %1047 = vmatprep.mubr.f32.mxu0 %v1477_v19  ;;  %1078 = vmatprep.subr.mxu1 %v1381_v31 }
  0x4e   :  { %1092 = vmatprep.subr.mxu0 %v1250_v23  ;;  %1048 = vmatmul.mubr.f32.gmra.mxu0 %v1482_v48 }
  0x4f   :  { %1079 = vmatpush3.msra.mxu1 %v1381_v31  ;;  %1093 = vmatpush3.msra.mxu0 %v1250_v23 }
  0x50   :  { %1080 = vmatprep.subr.mxu1 %v1393_v38  ;;  %1094 = vmatprep.subr.mxu0 %v1259_v26 }
  0x51   :  { %1081 = vmatpush3.msra.mxu1 %v1393_v38  ;;  %1082 = vmatprep.mubr.f32.mxu1 %v1649_v21 }
  0x52   :  { %1095 = vmatpush3.msra.mxu0 %v1259_v26  ;;  %1083 = vmatmul.mubr.f32.vlgmr.msra.gmra.mxu1 %v1650_v22 }
  0x53   :  { %1096 = vmatprep.subr.mxu0 %v1264_v28  ;;  %1126 = vmatprep.subr.mxu1 %v1193_v3 }
  0x54   :  { %1097 = vmatpush3.msra.mxu0 %v1264_v28  ;;  %1127 = vmatpush3.msra.mxu1 %v1193_v3  ;;  %v36_v28 = vstv %s1645_s2 }
  0x55   :  { %1098 = vmatprep.subr.mxu0 %v1289_v39  ;;  %1128 = vmatprep.subr.mxu1 %v1195_v4 }
  0x56   :  { %1085 = vmatprep.mubr.f32.mxu1 %v140_v20  ;;  %1099 = vmatpush3.msra.mxu0 %v1289_v39 }
  0x57   :  { %1129 = vmatpush3.msra.mxu1 %v1195_v4  ;;  %1100 = vmatprep.subr.mxu0 %v1298_v42 }
  0x58   :  { %1086 = vmatmul.mubr.f32.gmra.mxu1 %v150_v29  ;;  %1130 = vmatprep.subr.mxu1 %v1197_v5 }
  0x59   :  { %1101 = vmatpush3.msra.mxu0 %v1298_v42  ;;  %1131 = vmatpush3.msra.mxu1 %v1197_v5 }
  0x5a   :  { %1102 = vmatprep.subr.mxu0 %v1322_v52  ;;  %1132 = vmatprep.subr.mxu1 %v1208_v9 }
  0x5b   :  { %1103 = vmatpush3.msra.mxu0 %v1322_v52  ;;  %1133 = vmatpush3.msra.mxu1 %v1208_v9 }
  0x5c   :  { %1104 = vmatprep.subr.mxu0 %v1337_v58  ;;  %1134 = vmatprep.subr.mxu1 %v1210_v10 }
  0x5d   :  { %1105 = vmatpush3.msra.mxu0 %v1337_v58  ;;  %1135 = vmatpush3.msra.mxu1 %v1210_v10 }
  0x5e   :  { %1106 = vmatprep.subr.mxu0 %v1354_v1  ;;  %1136 = vmatprep.subr.mxu1 %v1212_v11 }
  0x5f   :  { %1107 = vmatpush3.msra.mxu0 %v1354_v1  ;;  %1137 = vmatpush3.msra.mxu1 %v1212_v11 }
  0x60   :  { %1108 = vmatprep.subr.mxu0 %v1369_v13  ;;  %1138 = vmatprep.subr.mxu1 %v1227_v16 }
  0x61   :  { %1109 = vmatpush3.msra.mxu0 %v1369_v13  ;;  %1139 = vmatpush3.msra.mxu1 %v1227_v16 }
  0x62   :  { %1110 = vmatprep.subr.mxu0 %v1390_v37  ;;  %1140 = vmatprep.subr.mxu1 %v1252_v24 }
  0x63   :  { %1111 = vmatpush3.msra.mxu0 %v1390_v37  ;;  %1141 = vmatpush3.msra.mxu1 %v1252_v24 }
  0x64   :  { %1112 = vmatprep.subr.mxu0 %v1403_v49  ;;  %1142 = vmatprep.subr.mxu1 %v1261_v27 }
  0x65   :  { %1113 = vmatpush3.msra.mxu0 %v1403_v49  ;;  %1143 = vmatpush3.msra.mxu1 %v1261_v27 }
  0x66   :  { %1114 = vmatprep.subr.mxu0 %v1415_v56  ;;  %1144 = vmatprep.subr.mxu1 %v1280_v34 }
  0x67   :  { %1115 = vmatpush3.msra.mxu0 %v1415_v56  ;;  %1145 = vmatpush3.msra.mxu1 %v1280_v34 }
  0x68   :  { %1116 = vmatprep.subr.mxu0 %v1431_v12  ;;  %1146 = vmatprep.subr.mxu1 %v1304_v45 }
  0x69   :  { %1117 = vmatpush3.msra.mxu0 %v1431_v12  ;;  %1147 = vmatpush3.msra.mxu1 %v1304_v45 }
  0x6a   :  { %1118 = vmatprep.subr.mxu0 %v1438_v36  ;;  %1148 = vmatprep.subr.mxu1 %v1310_v47 }
  0x6b   :  { %1119 = vmatpush3.msra.mxu0 %v1438_v36  ;;  %1120 = vmatprep.mubr.f32.mxu0 %v1345_v61 }
  0x6c   :  { %1149 = vmatpush3.msra.mxu1 %v1310_v47  ;;  %1121 = vmatmul.mubr.f32.vlgmr.msra.gmra.mxu0 %v1348_v62 }
  0x6d   :  { %1150 = vmatprep.subr.mxu1 %v1334_v57  ;;  %1123 = vmatprep.mubr.f32.mxu0 %v1464_v15 }
  0x6e   :  { %1151 = vmatpush3.msra.mxu1 %v1334_v57  ;;  %1158 = vmatprep.mubr.f32.mxu1 %v1345_v61 }
  0x6f   :  { %1152 = vmatprep.subr.mxu1 %v1363_v8 }
  0x70   :  { %1153 = vmatpush3.msra.mxu1 %v1363_v8  ;;  %1124 = vmatmul.mubr.f32.gmra.mxu0 %v1468_v17 }
  0x71   :  { %1154 = vmatprep.subr.mxu1 %v1381_v31 }
  0x72   :  { %1155 = vmatpush3.msra.mxu1 %v1381_v31 }
  0x73   :  { %1156 = vmatprep.subr.mxu1 %v1393_v38 }
  0x74   :  { %1157 = vmatpush3.msra.mxu1 %v1393_v38 }
  0x75   :  { %1159 = vmatmul.mubr.f32.vlgmr.msra.gmra.mxu1 %v1348_v62 }
  0x76   :  { %1161 = vmatprep.mubr.f32.mxu1 %v1464_v15 }
  0x79   :  { %1162 = vmatmul.mubr.f32.gmra.mxu1 %v1468_v17 }
  0xe5   :  { %v970_v3 = vpop.f32.mrf.mxu0 }
  0xe6   :  { %v135_v39 = vadd.f32 %v970_v3, %v36_v28 }
  0xe7   :  { %v124_v4 = vpop.f32.mrf.mxu0 }
  0xe8   :  { %v125_v47 = vadd.f32 %v124_v4, %v36_v28 }
  0xed   :  { %v1008_v9 = vpop.f32.mrf.mxu1 }
  0xee   :  { %v312_v58 = vadd.f32 %v1008_v9, %v135_v39 }
  0xef   :  { %v305_v11 = vpop.f32.mrf.mxu1 }
  0xf0   :  { %v306_v1 = vadd.f32 %v305_v11, %v125_v47 }
 0x102   :  { %v973_v5 = vpop.f32.mrf.mxu0 }
 0x103   :  { %v155_v52 = vadd.f32 %v973_v5, %v36_v28 }
 0x104   :  { %v144_v10 = vpop.f32.mrf.mxu0 }
 0x105   :  { %v145_v60 = vadd.f32 %v144_v10, %v36_v28 }
 0x107   :  { %v1046_v16 = vpop.f32.mrf.mxu0 }
 0x108   :  { %v435_v6 = vadd.f32 %v1046_v16, %v312_v58 }
 0x109   :  { %v427_v24 = vpop.f32.mrf.mxu0 }
 0x10a   :  { %v428_v13 = vadd.f32 %v427_v24, %v306_v1 }
 0x10b   :  { %v1011_v23 = vpop.f32.mrf.mxu1 }
 0x10c   :  { %v324_v8 = vadd.f32 %v1011_v23, %v155_v52 }
 0x10d   :  { %v317_v26 = vpop.f32.mrf.mxu1 }
 0x10e   :  { %v1049_v27 = vpop.f32.mrf.mxu0  ;;  %v318_v25 = vadd.f32 %v317_v26, %v145_v60 }
 0x10f   :  { %v449_v37 = vadd.f32 %v1049_v27, %v324_v8 }
 0x110   :  { %v441_v42 = vpop.f32.mrf.mxu0 }
 0x111   :  { %v442_v51 = vadd.f32 %v441_v42, %v318_v25 }
 0x112   :  { %v1084_v34 = vpop.f32.mrf.mxu1 }
 0x113   :  { %v546_v30 = vadd.f32 %v1084_v34, %v435_v6 }
 0x114   :  { %v537_v45 = vpop.f32.mrf.mxu1 }
 0x115   :  { %v538_v38 = vadd.f32 %v537_v45, %v428_v13 }
 0x118   :  { %v1087_v61 = vpop.f32.mrf.mxu1 }
 0x119   :  { %v562_v56 = vadd.f32 %v1087_v61, %v449_v37 }
 0x11a   :  { %v553_v31 = vpop.f32.mrf.mxu1 }
 0x11b   :  { %v554_v18 = vadd.f32 %v553_v31, %v442_v51 }
 0x12c   :  { %v1122_v57 = vpop.f32.mrf.mxu0 }
 0x12d   :  { %v687_v40 = vadd.f32 %v1122_v57, %v546_v30 }
 0x12e   :  { %v680_v62 = vpop.f32.mrf.mxu0 }
 0x12f   :  { %v681_v59 = vadd.f32 %v680_v62, %v538_v38 }
 0x130   :  { %v1125_v32 = vpop.f32.mrf.mxu0 }
 0x131   :  { %v699_v35 = vadd.f32 %v1125_v32, %v562_v56 }
 0x132   :  { %v692_v7 = vpop.f32.mrf.mxu0 }
 0x133   :  { %v693_v44 = vadd.f32 %v692_v7, %v554_v18 }
 0x135   :  { %v1160_v49 = vpop.f32.mrf.mxu1 }
 0x136   :  { %v792_v2 = vadd.f32 %v1160_v49, %v687_v40 }
 0x137   :  { %v785_v12 = vpop.f32.mrf.mxu1 }
 0x138   :  { %809 = vst.msk [vmem:[%s1646_s3 + $0x8] sm:$0xff] %vm807_vm0, %v792_v2  ;;  %v786_v36 = vadd.f32 %v785_v12, %v681_v59 }
 0x139   :  { %v1163_v41 = vpop.f32.mrf.mxu1 }
 0x13a   :  { %808 = vst.msk [vmem:[%s1646_s3] sm:$0xff] %vm807_vm0, %v786_v36  ;;  %v804_v55 = vadd.f32 %v1163_v41, %v699_v35 }
 0x13b   :  { %v797_v54 = vpop.f32.mrf.mxu1 }
 0x13c   :  { %811 = vst.msk [vmem:[%s1646_s3 + $0x18] sm:$0xff] %vm807_vm0, %v804_v55  ;;  %v798_v63 = vadd.f32 %v797_v54, %v693_v44 }
 0x13e   :  { %810 = vst.msk [vmem:[%s1646_s3 + $0x10] sm:$0xff] %vm807_vm0, %v798_v63 }

</bundles_post_ra>
